<compile_context>
chip_gen: v7x
topology: tpu7x:2x2x1
jax: 0.10.0
libtpu: 0.0.40
codegen_flags: <defaults>
</compile_context>

<pallas_src>
import functools
import math

import jax
import jax.numpy as jnp
from jax.experimental import pallas as pl
from jax.experimental.pallas import tpu as pltpu


def _round_up(x, m):
    return ((x + m - 1) // m) * m


# Smallest per-TensorCore VMEM across targeted generations (v7x: 64 MiB; v5e/v6e: 128 MiB).
_V7X_VMEM_BYTES = 64 << 20
# Above this, the "all weights resident" design should be replaced (see TODO below).
_RESIDENT_WEIGHT_LIMIT = 44 << 20


def _mlp_fused_kernel(*refs, num_layers):
    """refs = (x_ref, w0_ref, ..., w{L-1}_ref, o_ref).

    Computes o = w_{L-1}(relu(... relu(x @ w0) ...)) for one row tile.
    Weights are bf16 in (in_features, out_features) layout; every matmul accumulates
    in f32 via preferred_element_type, intermediates are re-cast to bf16 for the MXU.
    """
    x_ref = refs[0]
    w_refs = refs[1:1 + num_layers]
    o_ref = refs[1 + num_layers]

    h = x_ref[...].astype(jnp.bfloat16)
    h = jnp.dot(h, w_refs[0][...], preferred_element_type=jnp.float32)
    for w_ref in w_refs[1:]:
        h = jnp.maximum(h, 0.0).astype(jnp.bfloat16)   # fused ReLU between layers
        h = jnp.dot(h, w_ref[...], preferred_element_type=jnp.float32)
    o_ref[...] = h.astype(o_ref.dtype)


def _choose_tile_m(m, k0, n_out_pad, max_hidden, weight_bytes):
    """Row-tile size: sublane aligned, VMEM-budget aware, megacore friendly."""
    m8 = _round_up(max(m, 1), 8)
    # Per-row activation bytes: double-buffered x & out tiles (f32) + one intermediate.
    per_row = 4 * (2 * k0 + 2 * n_out_pad + max_hidden)
    act_budget = max(_V7X_VMEM_BYTES - int(1.25 * weight_bytes) - (8 << 20), 2 << 20)
    cap = 512                      # 512+ tiles amortize the ~0.35us per-grid-step cost
    while cap > 8 and cap * per_row > act_budget:
        cap //= 2
    tm = _round_up(min(m8, max(cap, 8)), 8)
    # v7x has 2 TensorCores: avoid a length-1 grid for large M so "parallel" actually
    # splits row tiles across cores (no-op on single-TC v5e/v6e).
    if pl.cdiv(m8, tm) == 1 and tm >= 512:
        tm = _round_up(tm // 2, 8)
    return tm


def mlp_forward_pallas(x2d, weights_t, n_out):
    """x2d: (M, K0) float32.  weights_t[i]: (in_i, out_i) bf16, last padded to 128 lanes."""
    M, K0 = x2d.shape
    assert weights_t[0].shape[0] == K0, (x2d.shape, weights_t[0].shape)
    n_out_pad = weights_t[-1].shape[1]
    max_hidden = max(w.shape[1] for w in weights_t)
    weight_bytes = sum(w.size * w.dtype.itemsize for w in weights_t)

    # TODO(synk): if weight_bytes > _RESIDENT_WEIGHT_LIMIT (v7x keeps a full weight copy
    # per TensorCore under megacore sharding), fall back to a per-layer K/N-tiled kernel
    # with an f32 VMEM accumulator instead of keeping all weights resident.

    tm = _choose_tile_m(M, K0, n_out_pad, max_hidden, weight_bytes)

    # Only sublane-align the rows (<=7 zero rows, exact through bias-free Linear+ReLU);
    # a ragged last tile is handled by Pallas partial blocks: the math is row-independent
    # and out-of-bounds output rows are masked on store.
    m8 = _round_up(M, 8)
    if m8 != M:
        x2d = jnp.pad(x2d, ((0, m8 - M), (0, 0)))

    grid = (pl.cdiv(m8, tm),)

    in_specs = [pl.BlockSpec((tm, K0), lambda i: (i, 0))]
    for w in weights_t:
        k, n = w.shape
        # Grid-invariant weight block: single VMEM buffer (no useless double-buffering).
        in_specs.append(
            pl.BlockSpec((k, n), lambda i: (0, 0), pipeline_mode=pl.Buffered(1)))
    out_specs = pl.BlockSpec((tm, n_out_pad), lambda i: (i, 0))

    kernel = functools.partial(_mlp_fused_kernel, num_layers=len(weights_t))

    # Scoped VMEM budget: resident weights + double-buffered activation tiles + headroom.
    act_bytes = 4 * tm * (2 * K0 + 2 * n_out_pad + max_hidden)
    vmem_limit = int(1.25 * (weight_bytes + act_bytes)) + (4 << 20)
    vmem_limit = min(max(vmem_limit, 32 << 20), _V7X_VMEM_BYTES)

    flops = 2 * m8 * sum(w.shape[0] * w.shape[1] for w in weights_t)
    bytes_accessed = (x2d.size * x2d.dtype.itemsize
                      + weight_bytes
                      + m8 * n_out_pad * 4)

    out = pl.pallas_call(
        kernel,
        out_shape=jax.ShapeDtypeStruct((m8, n_out_pad), x2d.dtype),
        grid=grid,
        in_specs=in_specs,
        out_specs=out_specs,
        compiler_params=pltpu.CompilerParams(
            dimension_semantics=("parallel",),       # megacore split over row tiles
            vmem_limit_bytes=vmem_limit,
        ),
        cost_estimate=pl.CostEstimate(
            flops=flops, transcendentals=0, bytes_accessed=bytes_accessed),
    )(x2d, *weights_t)

    if m8 != M or n_out_pad != n_out:
        out = out[:M, :n_out]
    return out


class MLPPallas:
    """JAX/Pallas re-implementation of the PyTorch MLP (bias-free Linears + ReLU)."""

    def __init__(self, n_units, init_scale=1.0, key=None):
        self._n_units = list(n_units)
        self._n_out = n_units[-1]
        if key is None:
            key = jax.random.PRNGKey(0)
        self.weights = []        # PyTorch convention: (out_features, in_features), f32
        for i in range(1, len(n_units)):
            key, sub = jax.random.split(key)
            fan_in, fan_out = n_units[i - 1], n_units[i]
            variance = math.sqrt(2.0 / (fan_in + fan_out))
            w = init_scale * variance * jax.random.normal(
                sub, (fan_out, fan_in), dtype=jnp.float32)
            self.weights.append(w)
        # Kernel-side layout: (in_features, out_features), bf16 (native MXU path with
        # f32 accumulation).  The last weight is zero-padded to a multiple of 128 output
        # columns so the kernel's output slab is lane-dense (unmasked vector stores).
        wt = [jnp.asarray(w.T) for w in self.weights]
        n_out_pad = _round_up(self._n_out, 128)
        if n_out_pad != self._n_out:
            wt[-1] = jnp.pad(wt[-1], ((0, 0), (0, n_out_pad - self._n_out)))
        self.weights_t = [w.astype(jnp.bfloat16) for w in wt]

    def __call__(self, x):
        x2d = jnp.reshape(x, (-1, self._n_units[0]))
        return mlp_forward_pallas(x2d, self.weights_t, self._n_out)


def _reference_f32(x, weights, n_units):
    """Pure-JAX f32 reference matching the PyTorch forward."""
    x = jnp.reshape(x, (-1, n_units[0]))
    out = x @ weights[0].T
    for w in weights[1:]:
        out = jnp.maximum(out, 0.0)
        out = out @ w.T
    return out


def _reference_bf16(x, weights, n_units):
    """Pure-JAX reference using the same bf16-input / f32-accumulate path as the kernel."""
    x = jnp.reshape(x, (-1, n_units[0]))
    out = jnp.dot(x.astype(jnp.bfloat16), weights[0].T.astype(jnp.bfloat16),
                  preferred_element_type=jnp.float32)
    for w in weights[1:]:
        out = jnp.maximum(out, 0.0).astype(jnp.bfloat16)
        out = jnp.dot(out, w.T.astype(jnp.bfloat16),
                      preferred_element_type=jnp.float32)
    return out


if __name__ == "__main__":
    key = jax.random.PRNGKey(0)
    k_x, k_w = jax.random.split(key)

    # Input (2, 4, 16, 16) -> flattened to (8, 256) with n_units[0] = 256.
    n_units = [256, 128, 64]
    x = jax.random.normal(k_x, (2, 4, 16, 16), dtype=jnp.float32)

    mlp = MLPPallas(n_units, init_scale=1.0, key=k_w)
    out = jax.block_until_ready(mlp(x))

    assert out.shape == (8, n_units[-1]), out.shape
    ref16 = _reference_bf16(x, mlp.weights, n_units)
    ref32 = _reference_f32(x, mlp.weights, n_units)
    assert jnp.allclose(out, ref16, atol=2e-3, rtol=2e-3), "mismatch vs bf16 reference"
    assert jnp.allclose(out, ref32, atol=6e-2, rtol=6e-2), "mismatch vs f32 reference"

    print("KERNEL_OK")
</pallas_src>

<mosaic_0001>
module attributes {stable_mosaic.version = 11 : i64} {
  func.func @_mlp_fused_kernel(%arg0: i32, %arg1: memref<8x256xf32, #tpu.memory_space<vmem>>, %arg2: memref<256x128xbf16, #tpu.memory_space<vmem>>, %arg3: memref<128x128xbf16, #tpu.memory_space<vmem>>, %arg4: memref<8x128xf32, #tpu.memory_space<vmem>>) attributes {dimension_semantics = [#tpu.dimension_semantics<parallel>], iteration_bounds = array<i64: 1>, scalar_prefetch = 0 : i64, scratch_operands = 0 : i64, tpu.core_type = #tpu.core_type<tc>, window_params = [{transform_indices = @transform_0, window_bounds = array<i64: 8, 256>}, {pipeline_mode = #tpu.pipeline_mode<synchronous>, transform_indices = @transform_1, window_bounds = array<i64: 256, 128>}, {pipeline_mode = #tpu.pipeline_mode<synchronous>, transform_indices = @transform_2, window_bounds = array<i64: 128, 128>}, {transform_indices = @transform_3, window_bounds = array<i64: 8, 128>}]} {
    %c0 = arith.constant 0 : index
    %c0_0 = arith.constant 0 : index
    %0 = vector.load %arg1[%c0, %c0_0] : memref<8x256xf32, #tpu.memory_space<vmem>>, vector<8x256xf32>
    %1 = arith.truncf %0 : vector<8x256xf32> to vector<8x256xbf16>
    %c0_1 = arith.constant 0 : index
    %c0_2 = arith.constant 0 : index
    %2 = vector.load %arg2[%c0_1, %c0_2] : memref<256x128xbf16, #tpu.memory_space<vmem>>, vector<256x128xbf16>
    %cst = arith.constant dense<0.000000e+00> : vector<8x128xf32>
    %3 = tpu.matmul %1, %2, %cst {dimension_numbers = #tpu.dot_dimension_numbers<[1], [0], [0], [1], [0, 0, 1, 1], [], []>} : vector<8x256xbf16>, vector<256x128xbf16>, vector<8x128xf32> -> vector<8x128xf32>
    %cst_3 = arith.constant 0.000000e+00 : f32
    %4 = vector.broadcast %cst_3 : f32 to vector<8x128xf32>
    %5 = arith.maximumf %3, %4 : vector<8x128xf32>
    %6 = arith.truncf %5 : vector<8x128xf32> to vector<8x128xbf16>
    %c0_4 = arith.constant 0 : index
    %c0_5 = arith.constant 0 : index
    %7 = vector.load %arg3[%c0_4, %c0_5] : memref<128x128xbf16, #tpu.memory_space<vmem>>, vector<128x128xbf16>
    %cst_6 = arith.constant dense<0.000000e+00> : vector<8x128xf32>
    %8 = tpu.matmul %6, %7, %cst_6 {dimension_numbers = #tpu.dot_dimension_numbers<[1], [0], [0], [1], [0, 0, 1, 1], [], []>} : vector<8x128xbf16>, vector<128x128xbf16>, vector<8x128xf32> -> vector<8x128xf32>
    %c0_7 = arith.constant 0 : index
    %c0_8 = arith.constant 0 : index
    %9 = vector.load %arg4[%c0_7, %c0_8] : memref<8x128xf32, #tpu.memory_space<vmem>>, vector<8x128xf32>
    tpu.vector_store %arg4[%c0_7, %c0_8], %8 {strides = array<i32>} : memref<8x128xf32, #tpu.memory_space<vmem>>, vector<8x128xf32>,
    return
  }
  func.func @transform_0(%arg0: i32) -> (i32, i32) {
    %c0_i32 = arith.constant 0 : i32
    %c0_i32_0 = arith.constant 0 : i32
    return %arg0, %c0_i32 : i32, i32
  }
  func.func @transform_1(%arg0: i32) -> (i32, i32) {
    %c0_i32 = arith.constant 0 : i32
    %c0_i32_0 = arith.constant 0 : i32
    %c0_i32_1 = arith.constant 0 : i32
    return %c0_i32, %c0_i32_0 : i32, i32
  }
  func.func @transform_2(%arg0: i32) -> (i32, i32) {
    %c0_i32 = arith.constant 0 : i32
    %c0_i32_0 = arith.constant 0 : i32
    %c0_i32_1 = arith.constant 0 : i32
    return %c0_i32, %c0_i32_0 : i32, i32
  }
  func.func @transform_3(%arg0: i32) -> (i32, i32) {
    %c0_i32 = arith.constant 0 : i32
    %c0_i32_0 = arith.constant 0 : i32
    return %arg0, %c0_i32 : i32, i32
  }
}

</mosaic_0001>

<bundles_post_ra>
// kernel: tpu_custom_call.1
= control target key start
LH: loop header
LB: loop body
LE: loop exit
PB: predicated region body
PF: predicated region fallthrough
CT: control target
= control target key end

     0   :  { %8 = vsyncpa [#allocation3], 0  ;;  %s642_s0 = inlined_call_operand.hbm [shape: f32[8,256], index: 0, kind: input, shape index: {}]   ;;  %s643_s1 = inlined_call_operand.hbm [shape: bf16[256,128], index: 1, kind: input, shape index: {}]   ;;  %s644_s2 = inlined_call_operand.hbm [shape: bf16[128,128], index: 2, kind: input, shape index: {}]   ;;  %s645_s3 = inlined_call_operand.hbm [shape: f32[8,128], index: 3, kind: output, shape index: {}]  }
   0x1   :  { %9 = vsyncpa [#allocation6], 0 }
   0x2   :  { %10 = vsyncpa [#allocation4], 0  ;;  %s551_s12 = smov [#allocation5]   ;;  %s457_s16 = scalar_lea.hbm %s643_s1, 2048 }
   0x3   :  { %s26_s13 = sshll.u32 %s551_s12, 4  ;;  %p458_p0 = scmp.ne.s32.totalorder %s643_s1, %s457_s16  ;;  %s27_s13 = int_to_ptr.vmem [resolvable:$true] %s26_s13 }
   0x4   :  { %p461_p1 = scmp.lt.u32.totalorder %s457_s16, %s643_s1 }
   0x6   :  { %p463_p2 = pnand %p461_p1, %p458_p0 }
   0x8   :  { %466 = shalt.err (!%p463_p2)
}
   0x9   :  { %s467_s21 = scalar_lea.vmem %s27_s13, 2048  ;;  %p472_p4 = scmp.lt.s32.totalorder %s27_s13, %s27_s13 }
   0xa   :  { %p468_p3 = scmp.ne.s32.totalorder %s27_s13, %s467_s21  ;;  %p473_p5 = scmp.lt.s32.totalorder %s467_s21, %s467_s21 }
   0xc   :  { %p474_p6 = por %p473_p5, %p472_p4 }
   0xe   :  { %p475_p7 = pnand %p474_p6, %p468_p3 }
  0x10   :  { %478 = shalt.err (!%p475_p7)
}
  0x11   :  { %s552_s22 = smov 64   ;;  %s553_s23 = smov 4  }
  0x12   :  { %32 = dma.hbm_to_vmem [thread:$0]  %s643_s1, 2048, %s27_s13, [#allocation6], %s552_s22, %s552_s22, %s553_s23  }
  0x13   :  { %s554_s26 = smov [#allocation2]   ;;  %s555_s28 = smov [#allocation7]  }
  0x14   :  { %s17_s27 = sshll.u32 %s554_s26, 4  ;;  %s38_s29 = sshll.u32 %s555_s28, 4  ;;  %s18_s27 = int_to_ptr.vmem [resolvable:$true] %s17_s27  ;;  %s39_s29 = int_to_ptr.vmem [resolvable:$true] %s38_s29 }
  0x15   :  { %s479_s5 = scalar_lea.hbm %s642_s0, 256 }
  0x16   :  { %p480_p8 = scmp.ne.s32.totalorder %s642_s0, %s479_s5  ;;  %p483_p9 = scmp.lt.u32.totalorder %s479_s5, %s642_s0 }
  0x18   :  { %p485_p10 = pnand %p483_p9, %p480_p8 }
  0x1a   :  { %488 = shalt.err (!%p485_p10)
}
  0x1b   :  { %s489_s1 = scalar_lea.vmem %s18_s27, 256  ;;  %p494_p12 = scmp.lt.s32.totalorder %s18_s27, %s18_s27 }
  0x1c   :  { %p490_p11 = scmp.ne.s32.totalorder %s18_s27, %s489_s1  ;;  %p495_p13 = scmp.lt.s32.totalorder %s489_s1, %s489_s1 }
  0x1e   :  { %p496_p0 = por %p495_p13, %p494_p12 }
  0x20   :  { %p497_p1 = pnand %p496_p0, %p490_p11 }
  0x22   :  { %500 = shalt.err (!%p497_p1)
}
  0x23   :  { %20 = dma.hbm_to_vmem [thread:$0]  %s642_s0, 256, %s18_s27, [#allocation3]  }
  0x24   :  { %s501_s14 = scalar_lea.hbm %s644_s2, 1024 }
  0x25   :  { %p502_p2 = scmp.ne.s32.totalorder %s644_s2, %s501_s14  ;;  %p505_p3 = scmp.lt.u32.totalorder %s501_s14, %s644_s2 }
  0x27   :  { %p507_p4 = pnand %p505_p3, %p502_p2 }
  0x29   :  { %510 = shalt.err (!%p507_p4)
}
  0x2a   :  { %s511_s19 = scalar_lea.vmem %s39_s29, 1024  ;;  %p516_p6 = scmp.lt.s32.totalorder %s39_s29, %s39_s29 }
  0x2b   :  { %p512_p5 = scmp.ne.s32.totalorder %s39_s29, %s511_s19  ;;  %p517_p7 = scmp.lt.s32.totalorder %s511_s19, %s511_s19 }
  0x2d   :  { %p518_p8 = por %p517_p7, %p516_p6 }
  0x2f   :  { %p519_p9 = pnand %p518_p8, %p512_p5 }
  0x31   :  { %522 = shalt.err (!%p519_p9)
}
  0x32   :  { %44 = dma.hbm_to_vmem [thread:$0]  %s644_s2, 1024, %s39_s29, [#allocation6], %s552_s22, %s552_s22, %s553_s23  }
  0x33   :  { %545 = dma.done.wait [#allocation3], 256  }
  0x34   :  { %546 = vsyncadd [#allocation3], 4294967040 }
  0x35   :  { %547 = dma.done.wait [#allocation6], 3072  }
  0x36   :  { %548 = vsyncadd [#allocation6], 4294964224  ;;  %v556_v0 = vmov 0.0   ;;  %v433_v1 = vld [vmem:[#allocation5 + $0x40] sm:$0xff]   ;;  %v435_v3 = vld [vmem:[#allocation5 + $0x48] sm:$0xff]   ;;  %vm557_vm0 = vmmov 0  }
  0x37   :  { %405 = vmatprep.subr.bf16.mxu1 %v556_v0  ;;  %v434_v2 = vld [vmem:[#allocation5] sm:$0xff]   ;;  %374 = vmatprep.subr.bf16.mxu0 %v433_v1  ;;  %v436_v4 = vld [vmem:[#allocation5 + $0x8] sm:$0xff]   ;;  %v437_v5 = vld [vmem:[#allocation5 + $0x50] sm:$0xff]   ;;  %s558_s2 = smov [#allocation8]  }
  0x38   :  { %375 = vmatpush3.bf16.msra.mxu0 %v434_v2  ;;  %v438_v6 = vld [vmem:[#allocation5 + $0x10] sm:$0xff]   ;;  %v439_v7 = vld [vmem:[#allocation5 + $0x58] sm:$0xff]   ;;  %v441_v9 = vld [vmem:[#allocation5 + $0x60] sm:$0xff]   ;;  %421 = vmatprep.mubr.msk.bf16.mxu1 %vm557_vm0, %v556_v0  ;;  %s340_s21 = sshll.u32 %s558_s2, 4  ;;  %s341_s21 = int_to_ptr.vmem [resolvable:$true] %s340_s21 }
  0x39   :  { %376 = vmatprep.subr.bf16.mxu0 %v435_v3  ;;  %v440_v8 = vld [vmem:[#allocation5 + $0x18] sm:$0xff]   ;;  %v442_v10 = vld [vmem:[#allocation5 + $0x20] sm:$0xff]   ;;  %v443_v11 = vld [vmem:[#allocation5 + $0x68] sm:$0xff]   ;;  %s523_s22 = scalar_lea.vmem %s341_s21, 128  ;;  %p528_p11 = scmp.lt.s32.totalorder %s341_s21, %s341_s21 }
  0x3a   :  { %v56_v12 = vld [vmem:[#allocation2 + $0x8] sm:$0xff]  ;;  %v449_v14 = vld [vmem:[#allocation7] sm:$0xff]   ;;  %v444_v15 = vld [vmem:[#allocation5 + $0x28] sm:$0xff]   ;;  %p524_p10 = scmp.ne.s32.totalorder %s341_s21, %s523_s22  ;;  %p529_p12 = scmp.lt.s32.totalorder %s523_s22, %s523_s22 }
  0x3b   :  { %v58_v13 = vpack.c.bf16 %v56_v12, %v56_v12  ;;  %v445_v16 = vld [vmem:[#allocation5 + $0x70] sm:$0xff]   ;;  %406 = vmatpush3.bf16.msra.mxu1 %v449_v14  ;;  %v450_v17 = vld [vmem:[#allocation7 + $0x8] sm:$0xff]   ;;  %v447_v19 = vld [vmem:[#allocation5 + $0x78] sm:$0xff]  }
  0x3c   :  { %377 = vmatpush3.bf16.msra.mxu0 %v436_v4  ;;  %407 = vmatprep.subr.bf16.mxu1 %v556_v0  ;;  %v446_v18 = vld [vmem:[#allocation5 + $0x30] sm:$0xff]   ;;  %v448_v21 = vld [vmem:[#allocation5 + $0x38] sm:$0xff]   ;;  %v453_v25 = vld [vmem:[#allocation7 + $0x20] sm:$0xff]   ;;  %p530_p13 = por %p529_p12, %p528_p11 }
  0x3d   :  { %378 = vmatprep.subr.bf16.mxu0 %v437_v5  ;;  %219 = vmatprep.mubr.bf16.mxu0 %v58_v13  ;;  %v451_v20 = vld [vmem:[#allocation7 + $0x10] sm:$0xff]   ;;  %v452_v23 = vld [vmem:[#allocation7 + $0x18] sm:$0xff]   ;;  %v454_v26 = vld [vmem:[#allocation7 + $0x28] sm:$0xff]  }
  0x3e   :  { %v55_v22 = vld [vmem:[#allocation2] sm:$0xff]  ;;  %v456_v28 = vld [vmem:[#allocation7 + $0x38] sm:$0xff]   ;;  %p531_p0 = pnand %p530_p13, %p524_p10 }
  0x3f   :  { %408 = vmatpush3.bf16.msra.mxu1 %v450_v17  ;;  %v57_v24 = vpack.c.bf16 %v55_v22, %v55_v22  ;;  %v455_v27 = vld [vmem:[#allocation7 + $0x30] sm:$0xff]  }
  0x40   :  { %379 = vmatpush3.bf16.msra.mxu0 %v438_v6  ;;  %409 = vmatprep.subr.bf16.mxu1 %v556_v0 }
  0x41   :  { %380 = vmatprep.subr.bf16.mxu0 %v439_v7 }
  0x43   :  { %410 = vmatpush3.bf16.msra.mxu1 %v451_v20 }
  0x44   :  { %381 = vmatpush3.bf16.msra.mxu0 %v440_v8  ;;  %411 = vmatprep.subr.bf16.mxu1 %v556_v0 }
  0x45   :  { %382 = vmatprep.subr.bf16.mxu0 %v441_v9 }
  0x47   :  { %412 = vmatpush3.bf16.msra.mxu1 %v452_v23 }
  0x48   :  { %383 = vmatpush3.bf16.msra.mxu0 %v442_v10  ;;  %413 = vmatprep.subr.bf16.mxu1 %v556_v0 }
  0x49   :  { %384 = vmatprep.subr.bf16.mxu0 %v443_v11 }
  0x4b   :  { %414 = vmatpush3.bf16.msra.mxu1 %v453_v25 }
  0x4c   :  { %385 = vmatpush3.bf16.msra.mxu0 %v444_v15  ;;  %415 = vmatprep.subr.bf16.mxu1 %v556_v0 }
  0x4d   :  { %386 = vmatprep.subr.bf16.mxu0 %v445_v16 }
  0x4f   :  { %416 = vmatpush3.bf16.msra.mxu1 %v454_v26 }
  0x50   :  { %387 = vmatpush3.bf16.msra.mxu0 %v446_v18  ;;  %417 = vmatprep.subr.bf16.mxu1 %v556_v0 }
  0x51   :  { %388 = vmatprep.subr.bf16.mxu0 %v447_v19 }
  0x53   :  { %418 = vmatpush3.bf16.msra.mxu1 %v455_v27 }
  0x54   :  { %389 = vmatpush3.bf16.msra.mxu0 %v448_v21  ;;  %419 = vmatprep.subr.bf16.mxu1 %v556_v0 }
  0x57   :  { %220 = vmatmul.mubr.bf16.vlgmr.msra.gmra.mrb[0].mxu0 %v57_v24  ;;  %420 = vmatpush3.bf16.msra.mxu1 %v456_v28 }
 0x12a   :  { %v390_v29 = vpop.f32.mrb[0].mxu0 }
 0x12b   :  { %v391_v30 = vpop.f32.mrb[1].mxu0 }
 0x12c   :  { %v392_v31 = vadd.f32 %v391_v30, %v390_v29  ;;  %v393_v32 = vpop.f32.mrb[2].mxu0 }
 0x12d   :  { %v394_v33 = vpop.f32.mrb[3].mxu0 }
 0x12e   :  { %v227_v34 = vmax.f32 %v392_v31, 0.0 }
 0x130   :  { %v228_v35 = vpack.c.bf16 %v227_v34, %v227_v34 }
 0x132   :  { %422 = vmatmul.mubr.bf16.vlgmr.msra.gmra.mrb[0].mxu1 %v228_v35 }
 0x205   :  { %v327_v36 = vpop.f32.mrb[0].mxu1 }
 0x206   :  { %333 = vst [vmem:[#allocation8] sm:$0xff] %v327_v36  ;;  %v423_v37 = vpop.f32.mrb[1].mxu1 }
 0x207   :  { %v330_v38 = vpop.f32.mrb[2].mxu1 }
 0x208   :  { %534 = shalt.err (!%p531_p0)
}
 0x209   :  { %s535_s25 = scalar_lea.hbm %s645_s3, 128 }
 0x20a   :  { %p536_p1 = scmp.ne.s32.totalorder %s645_s3, %s535_s25  ;;  %p539_p2 = scmp.lt.u32.totalorder %s535_s25, %s645_s3 }
 0x20c   :  { %p541_p3 = pnand %p539_p2, %p536_p1 }
 0x20e   :  { %544 = shalt.err (!%p541_p3)
}
 0x20f   :  { %343 = dma.vmem_to_hbm [thread:$0]  %s341_s21, 128, %s645_s3, [#allocation4]   ;;  %v424_v39 = vpop.f32.mrb[3].mxu1 }
 0x210   :  { %549 = dma.done.wait [#allocation4], 128  }
 0x211   :  { %550 = vsyncadd [#allocation4], 4294967168 }
 0x212   :  { %347 = vsyncpa [#allocation3], 1 }
 0x213   :  { %348 = vsyncpa [#allocation6], 1 }
 0x214   :  { %349 = vsyncpa [#allocation4], 1 }

</bundles_post_ra>
